<compile_context>
chip_gen: v6e
topology: v6e:2x2x1
jax: 0.10.0
libtpu: 0.0.40
codegen_flags: <defaults>
</compile_context>

<pallas_src>
import functools
import math

import jax
import jax.numpy as jnp
from jax import lax
from jax.experimental import pallas as pl
from jax.experimental.pallas import tpu as pltpu

_MASK_VALUE = -1e30  # large finite negative: exp() underflows to exactly 0 in f32


# ---------------------------------------------------------------------------
# Hardware-aware knobs
# ---------------------------------------------------------------------------
def _vmem_limit_bytes():
    """Generation-appropriate VMEM budget with headroom below physical VMEM."""
    cap = None
    try:
        info = pltpu.get_tpu_info()
        cap = int(getattr(info, "vmem_capacity_bytes", 0)) or None
    except Exception:
        cap = None
    if cap is None:
        cap = 64 * 1024 * 1024  # conservative fallback: assume v7x-sized VMEM
    # leave ~16 MiB for compiler-internal scratch / pipeline buffers; cap at 112 MiB
    return int(min(max(cap - 16 * 1024 * 1024, 32 * 1024 * 1024),
                   112 * 1024 * 1024))


def _device_kind():
    try:
        return jax.devices()[0].device_kind.lower()
    except Exception:
        return ""


def _pick_block(n, preferred, candidates):
    """Largest candidate <= preferred that divides n; full extent otherwise."""
    if n <= preferred:
        return n
    for b in candidates:
        if b <= preferred and n % b == 0:
            return b
    return n


# ---------------------------------------------------------------------------
# Kernel A: fused QKV projection (rows of the flattened (B*T, d_in) input),
# tiled over both the row axis and the 3*d_out output axis.
# ---------------------------------------------------------------------------
def _qkv_proj_kernel(x_ref, w_ref, o_ref):
    # x_ref: (tr, d_in) bf16, w_ref: (d_in, tn) bf16 (pre-transposed, q-scaled)
    o_ref[...] = jnp.dot(
        x_ref[...], w_ref[...], preferred_element_type=jnp.float32
    ).astype(o_ref.dtype)


# ---------------------------------------------------------------------------
# Kernel B: flash attention (online softmax) + fused output projection.
# ---------------------------------------------------------------------------
def _flash_attn_kernel(q_ref, k_ref, v_ref, wo_ref, o_ref,
                       m_sc, l_sc, acc_sc, *, tq, tk):
    # q_ref: (1, H, tq, hd) bf16 (scale already folded into Wq)
    # k_ref/v_ref: (1, H, tk, hd) bf16
    # wo_ref: (H, hd, d_out) bf16  (Wo.T arranged per head)
    # o_ref: (1, tq, d_out)
    qi = pl.program_id(1)
    ki = pl.program_id(2)
    nk = pl.num_programs(2)

    @pl.when(ki == 0)
    def _init():
        m_sc[...] = jnp.full_like(m_sc, -jnp.inf)
        l_sc[...] = jnp.zeros_like(l_sc)
        acc_sc[...] = jnp.zeros_like(acc_sc)

    # block is visible iff it has at least one unmasked (col <= row) entry
    visible = ki * tk < (qi + 1) * tq
    # block straddles the causal diagonal iff its last column can exceed the
    # first row of this q block (interior blocks below the diagonal need no mask)
    on_diag = (ki + 1) * tk - 1 > qi * tq

    def _update(apply_mask):
        q = q_ref[0]                      # (H, tq, hd) bf16
        k = k_ref[0]                      # (H, tk, hd) bf16
        v = v_ref[0]                      # (H, tk, hd) bf16

        # head-batched scores (1/sqrt(hd) already folded into q)
        s = jnp.einsum("hqd,hkd->hqk", q, k,
                       preferred_element_type=jnp.float32)   # (H, tq, tk) f32
        if apply_mask:
            row = qi * tq + lax.broadcasted_iota(jnp.int32, (tq, tk), 0)
            col = ki * tk + lax.broadcasted_iota(jnp.int32, (tq, tk), 1)
            s = jnp.where((col > row)[None, :, :], jnp.float32(_MASK_VALUE), s)

        m_prev = m_sc[...]                                        # (H, tq, 1)
        m_new = jnp.maximum(m_prev, s.max(axis=-1, keepdims=True))
        alpha = jnp.exp(m_prev - m_new)
        p = jnp.exp(s - m_new)                                    # (H, tq, tk) f32
        l_sc[...] = alpha * l_sc[...] + p.sum(axis=-1, keepdims=True)
        acc_sc[...] = alpha * acc_sc[...] + jnp.einsum(
            "hqk,hkd->hqd", p.astype(v.dtype), v,
            preferred_element_type=jnp.float32)
        m_sc[...] = m_new

    @pl.when(jnp.logical_and(visible, on_diag))
    def _compute_diag():               # diagonal block: causal mask applied
        _update(apply_mask=True)

    @pl.when(jnp.logical_and(visible, jnp.logical_not(on_diag)))
    def _compute_interior():           # fully-below-diagonal block: no mask work
        _update(apply_mask=False)

    @pl.when(ki == nk - 1)
    def _finalize():
        # normalize, then fuse "concat heads + out_proj": per-head MXU matmuls
        # accumulating directly into a (tq, d_out) f32 tile (no (H,tq,d_out)
        # f32 intermediate, H-reduction done in the accumulator).
        ctx = (acc_sc[...] * pl.reciprocal(l_sc[...], approx=True)
               ).astype(jnp.bfloat16)                              # (H, tq, hd)
        num_heads = ctx.shape[0]
        out2d = jnp.dot(ctx[0], wo_ref[0], preferred_element_type=jnp.float32)
        for h in range(1, num_heads):
            out2d = out2d + jnp.dot(ctx[h], wo_ref[h],
                                    preferred_element_type=jnp.float32)
        o_ref[0] = out2d.astype(o_ref.dtype)                       # (tq, d_out)


# ---------------------------------------------------------------------------
# Wrapper
# ---------------------------------------------------------------------------
def multi_head_attention(x, wq, wk, wv, wo, *, num_heads):
    B, T, d_in = x.shape
    d_out = wq.shape[0]
    head_dim = d_out // num_heads

    vmem_limit = _vmem_limit_bytes()
    kind = _device_kind()

    # --- one-time weight preprocessing (no in-kernel transposes) -------------
    scale = 1.0 / math.sqrt(head_dim)
    wqkv_t = jnp.concatenate(
        [(wq * scale).T, wk.T, wv.T], axis=1).astype(jnp.bfloat16)  # (d_in, 3*d_out)
    # Wo.T arranged per head: wo_heads[h, d, o] = wo[o, h*hd + d]
    wo_heads = jnp.transpose(
        wo.reshape(d_out, num_heads, head_dim), (1, 2, 0)).astype(jnp.bfloat16)

    # --- Kernel A: fused QKV projection, tiled over rows AND output columns --
    n_rows = B * T
    n_cols = 3 * d_out
    tr = _pick_block(n_rows, 256, (256, 128, 64, 32, 16, 8))
    tn = _pick_block(n_cols, 512, (512, 384, 256, 128))
    x2d_bf16 = x.reshape(n_rows, d_in).astype(jnp.bfloat16)

    qkv2d = pl.pallas_call(
        _qkv_proj_kernel,
        out_shape=jax.ShapeDtypeStruct((n_rows, n_cols), jnp.bfloat16),
        grid_spec=pltpu.PrefetchScalarGridSpec(
            num_scalar_prefetch=0,
            grid=(n_rows // tr, n_cols // tn),
            in_specs=[
                pl.BlockSpec((tr, d_in), lambda r, c: (r, 0)),
                pl.BlockSpec((d_in, tn), lambda r, c: (0, c)),
            ],
            out_specs=pl.BlockSpec((tr, tn), lambda r, c: (r, c)),
        ),
        compiler_params=pltpu.CompilerParams(
            dimension_semantics=("parallel", "parallel"),
            vmem_limit_bytes=vmem_limit),
    )(x2d_bf16, wqkv_t)

    # split / reshape to (B, H, T, hd) in the wrapper (plain XLA ops)
    qkv = qkv2d.reshape(B, T, 3, num_heads, head_dim)
    q = jnp.transpose(qkv[:, :, 0], (0, 2, 1, 3))   # (B, H, T, hd) bf16
    k = jnp.transpose(qkv[:, :, 1], (0, 2, 1, 3))
    v = jnp.transpose(qkv[:, :, 2], (0, 2, 1, 3))

    # --- Kernel B: flash attention + fused output projection -----------------
    # 256-wide tiles fill the 256x256 MXU on v6e/v7x; keep kv tiles at 128 on v5e.
    tq = _pick_block(T, 256, (256, 128, 64, 32, 16, 8))
    tk_pref = 128 if "v5" in kind else 256
    tk = _pick_block(T, tk_pref, (256, 128, 64, 32, 16, 8))
    kernel = functools.partial(_flash_attn_kernel, tq=tq, tk=tk)

    # Clamp the K/V block index at the causal diagonal so skipped blocks revisit
    # the already-resident block (Pallas elides the DMA when the index repeats).
    def _kv_map(b, qi, ki):
        return (b, 0, jnp.minimum(ki, ((qi + 1) * tq - 1) // tk), 0)

    out = pl.pallas_call(
        kernel,
        out_shape=jax.ShapeDtypeStruct((B, T, d_out), x.dtype),
        grid_spec=pltpu.PrefetchScalarGridSpec(
            num_scalar_prefetch=0,
            grid=(B, T // tq, T // tk),
            in_specs=[
                pl.BlockSpec((1, num_heads, tq, head_dim),
                             lambda b, qi, ki: (b, 0, qi, 0)),
                pl.BlockSpec((1, num_heads, tk, head_dim), _kv_map),
                pl.BlockSpec((1, num_heads, tk, head_dim), _kv_map),
                # constant index_map -> single-buffer (halves Wo VMEM residency)
                pl.BlockSpec((num_heads, head_dim, d_out),
                             lambda b, qi, ki: (0, 0, 0),
                             pipeline_mode=pl.Buffered(1)),
            ],
            out_specs=pl.BlockSpec((1, tq, d_out), lambda b, qi, ki: (b, qi, 0)),
            scratch_shapes=[
                pltpu.VMEM((num_heads, tq, 1), jnp.float32),          # m
                pltpu.VMEM((num_heads, tq, 1), jnp.float32),          # l
                pltpu.VMEM((num_heads, tq, head_dim), jnp.float32),   # acc
            ],
        ),
        compiler_params=pltpu.CompilerParams(
            dimension_semantics=("parallel", "parallel", "arbitrary"),
            vmem_limit_bytes=vmem_limit),
    )(q, k, v, wo_heads)
    return out


# ---------------------------------------------------------------------------
# Pure-JAX reference of the PyTorch forward (eval-mode dropout), f32.
# ---------------------------------------------------------------------------
def _reference(x, wq, wk, wv, wo, *, num_heads):
    B, T, d_in = x.shape
    d_out = wq.shape[0]
    hd = d_out // num_heads
    q = (x @ wq.T).reshape(B, T, num_heads, hd).transpose(0, 2, 1, 3)
    k = (x @ wk.T).reshape(B, T, num_heads, hd).transpose(0, 2, 1, 3)
    v = (x @ wv.T).reshape(B, T, num_heads, hd).transpose(0, 2, 1, 3)
    scores = jnp.einsum("bhqd,bhkd->bhqk", q, k)
    mask = jnp.triu(jnp.ones((T, T), bool), k=1)
    scores = jnp.where(mask[None, None], -jnp.inf, scores)
    attn = jax.nn.softmax(scores / math.sqrt(hd), axis=-1)
    ctx = jnp.einsum("bhqk,bhkd->bhqd", attn, v).transpose(0, 2, 1, 3).reshape(B, T, d_out)
    return ctx @ wo.T


if __name__ == "__main__":
    # small shapes: batch=2, seq=8, d_in=32, d_out=32, num_heads=4 (head_dim=8)
    B, T, D_IN, D_OUT, H = 2, 8, 32, 32, 4

    key = jax.random.PRNGKey(0)
    kx, kq, kk, kv, ko = jax.random.split(key, 5)

    x = jax.random.normal(kx, (B, T, D_IN), dtype=jnp.float32)
    bound_in = 1.0 / math.sqrt(D_IN)
    bound_out = 1.0 / math.sqrt(D_OUT)
    wq = jax.random.uniform(kq, (D_OUT, D_IN), jnp.float32, -bound_in, bound_in)
    wk = jax.random.uniform(kk, (D_OUT, D_IN), jnp.float32, -bound_in, bound_in)
    wv = jax.random.uniform(kv, (D_OUT, D_IN), jnp.float32, -bound_in, bound_in)
    wo = jax.random.uniform(ko, (D_OUT, D_OUT), jnp.float32, -bound_out, bound_out)

    out = multi_head_attention(x, wq, wk, wv, wo, num_heads=H)
    out = jax.block_until_ready(out)

    ref = _reference(x, wq, wk, wv, wo, num_heads=H)
    assert out.shape == (B, T, D_OUT)
    # bf16 MXU operands (f32 accumulation) -> compare with a bf16-appropriate tolerance
    assert jnp.allclose(out, ref, atol=3e-2, rtol=3e-2), float(jnp.max(jnp.abs(out - ref)))

    print("KERNEL_OK")
</pallas_src>

<mosaic_0001>
module attributes {stable_mosaic.version = 11 : i64} {
  func.func @_qkv_proj_kernel(%arg0: i32, %arg1: i32, %arg2: memref<16x32xbf16, #tpu.memory_space<vmem>>, %arg3: memref<32x96xbf16, #tpu.memory_space<vmem>>, %arg4: memref<16x96xbf16, #tpu.memory_space<vmem>>) attributes {dimension_semantics = [#tpu.dimension_semantics<parallel>, #tpu.dimension_semantics<parallel>], iteration_bounds = array<i64: 1, 1>, scalar_prefetch = 0 : i64, scratch_operands = 0 : i64, tpu.core_type = #tpu.core_type<tc>, window_params = [{transform_indices = @transform_0, window_bounds = array<i64: 16, 32>}, {transform_indices = @transform_1, window_bounds = array<i64: 32, 96>}, {transform_indices = @transform_2, window_bounds = array<i64: 16, 96>}]} {
    %c0 = arith.constant 0 : index
    %c0_0 = arith.constant 0 : index
    %0 = vector.load %arg2[%c0, %c0_0] : memref<16x32xbf16, #tpu.memory_space<vmem>>, vector<16x32xbf16>
    %c0_1 = arith.constant 0 : index
    %c0_2 = arith.constant 0 : index
    %1 = vector.load %arg3[%c0_1, %c0_2] : memref<32x96xbf16, #tpu.memory_space<vmem>>, vector<32x96xbf16>
    %cst = arith.constant dense<0.000000e+00> : vector<16x96xf32>
    %2 = tpu.matmul %0, %1, %cst {dimension_numbers = #tpu.dot_dimension_numbers<[1], [0], [0], [1], [0, 0, 1, 1], [], []>} : vector<16x32xbf16>, vector<32x96xbf16>, vector<16x96xf32> -> vector<16x96xf32>
    %3 = arith.truncf %2 : vector<16x96xf32> to vector<16x96xbf16>
    %c0_3 = arith.constant 0 : index
    %c0_4 = arith.constant 0 : index
    %4 = vector.load %arg4[%c0_3, %c0_4] : memref<16x96xbf16, #tpu.memory_space<vmem>>, vector<16x96xbf16>
    tpu.vector_store %arg4[%c0_3, %c0_4], %3 {strides = array<i32>} : memref<16x96xbf16, #tpu.memory_space<vmem>>, vector<16x96xbf16>,
    return
  }
  func.func @transform_0(%arg0: i32, %arg1: i32) -> (i32, i32) {
    %c0_i32 = arith.constant 0 : i32
    %c0_i32_0 = arith.constant 0 : i32
    return %arg0, %c0_i32 : i32, i32
  }
  func.func @transform_1(%arg0: i32, %arg1: i32) -> (i32, i32) {
    %c0_i32 = arith.constant 0 : i32
    %c0_i32_0 = arith.constant 0 : i32
    return %c0_i32, %arg1 : i32, i32
  }
  func.func @transform_2(%arg0: i32, %arg1: i32) -> (i32, i32) {
    %c0_i32 = arith.constant 0 : i32
    return %arg0, %arg1 : i32, i32
  }
}

</mosaic_0001>

<bundles_post_ra>
// kernel: tpu_custom_call.1
= control target key start
LH: loop header
LB: loop body
LE: loop exit
PB: predicated region body
PF: predicated region fallthrough
CT: control target
= control target key end

     0   :  { %7 = vsyncpa [#allocation3], 0  ;;  %s273_s0 = inlined_call_operand.hbm [shape: bf16[16,32], index: 0, kind: input, shape index: {}]   ;;  %s274_s1 = inlined_call_operand.hbm [shape: bf16[32,96], index: 1, kind: input, shape index: {}]   ;;  %s275_s2 = inlined_call_operand.hbm [shape: bf16[16,96], index: 2, kind: output, shape index: {}]  }
   0x1   :  { %8 = vsyncpa [#allocation6], 0 }
   0x2   :  { %9 = vsyncpa [#allocation4], 0  ;;  %s233_s9 = smov [#allocation2]  }
   0x3   :  { %s15_s10 = sshll.u32 %s233_s9, 4  ;;  %s16_s10 = int_to_ptr.vmem [resolvable:$true] %s15_s10 }
   0x4   :  { %s175_s11 = scalar_lea.vmem %s16_s10, 128  ;;  %p180_p1 = scmp.lt.s32.totalorder %s16_s10, %s16_s10 }
   0x5   :  { %p176_p0 = scmp.ne.s32.totalorder %s16_s10, %s175_s11  ;;  %p181_p2 = scmp.lt.s32.totalorder %s175_s11, %s175_s11 }
   0x7   :  { %p182_p3 = por %p181_p2, %p180_p1 }
   0x9   :  { %p183_p4 = pnand %p182_p3, %p176_p0 }
   0xb   :  { %186 = shalt.err (!%p183_p4)
}
   0xc   :  { %s234_s12 = smov 64   ;;  %s235_s13 = smov 4  }
   0xd   :  { %21 = dma.hbm_to_vmem [thread:$0]  %s273_s0, 128, %s16_s10, [#allocation3], %s234_s12, %s234_s12, %s235_s13  }
   0xe   :  { %s236_s16 = smov [#allocation5]  }
   0xf   :  { %s27_s17 = sshll.u32 %s236_s16, 4  ;;  %s28_s17 = int_to_ptr.vmem [resolvable:$true] %s27_s17 }
  0x10   :  { %s195_s18 = scalar_lea.vmem %s28_s17, 256  ;;  %p200_p6 = scmp.lt.s32.totalorder %s28_s17, %s28_s17 }
  0x11   :  { %p196_p5 = scmp.ne.s32.totalorder %s28_s17, %s195_s18  ;;  %p201_p7 = scmp.lt.s32.totalorder %s195_s18, %s195_s18 }
  0x13   :  { %p202_p8 = por %p201_p7, %p200_p6 }
  0x15   :  { %p203_p9 = pnand %p202_p8, %p196_p5 }
  0x17   :  { %206 = shalt.err (!%p203_p9)
}
  0x18   :  { %33 = dma.hbm_to_vmem [thread:$0]  %s274_s1, 256, %s28_s17, [#allocation6], %s234_s12, %s234_s12, %s235_s13  }
  0x19   :  { %227 = dma.done.wait [#allocation3], 128  }
  0x1a   :  { %228 = vsyncadd [#allocation3], 4294967168 }
  0x1b   :  { %229 = dma.done.wait [#allocation6], 256  }
  0x1c   :  { %230 = vsyncadd [#allocation6], 4294967040  ;;  %v237_v0 = vmov 0.0   ;;  %vm238_vm0 = vmmov 0   ;;  %v164_v1 = vld [vmem:[#allocation5 + $0x8] sm:$0xff]   ;;  %v165_v2 = vld [vmem:[#allocation5] sm:$0xff]  }
  0x1d   :  { %149 = vmatprep.subr.bf16.mxu0 %v237_v0  ;;  %153 = vmatprep.mubr.msk.bf16.mxu0 %vm238_vm0, %v237_v0  ;;  %v166_v3 = vld [vmem:[#allocation2] sm:$0xff]   ;;  %vm64_vm1 = vcmask 261120   ;;  %vm117_vm2 = vcmask 781312   ;;  %s239_s0 = smov [#allocation7]  }
  0x1e   :  { %150 = vmatpush3.bf16.msra.mxu0 %v164_v1  ;;  %s125_s1 = sshll.u32 %s239_s0, 4  ;;  %s126_s1 = int_to_ptr.vmem [resolvable:$true] %s125_s1 }
  0x1f   :  { %151 = vmatprep.subr.bf16.mxu0 %v237_v0  ;;  %s207_s21 = scalar_lea.vmem %s126_s1, 128  ;;  %p212_p11 = scmp.lt.s32.totalorder %s126_s1, %s126_s1 }
  0x20   :  { %p208_p10 = scmp.ne.s32.totalorder %s126_s1, %s207_s21  ;;  %p213_p12 = scmp.lt.s32.totalorder %s207_s21, %s207_s21 }
  0x22   :  { %152 = vmatpush3.bf16.msra.mxu0 %v165_v2  ;;  %p214_p13 = por %p213_p12, %p212_p11 }
  0x24   :  { %p215_p0 = pnand %p214_p13, %p208_p10 }
  0x25   :  { %154 = vmatmul.mubr.msk.bf16.vlgmr.msra.gmra.mxu0 %vm64_vm1, %v166_v3 }
  0xe5   :  { %v102_v4 = vpop.f32.mrf.mxu0 }
  0xe6   :  { %v144_v5 = vpack.c.bf16 %v102_v4, %v102_v4 }
  0xe7   :  { %v155_v6 = vpop.f32.mrf.mxu0 }
  0xe8   :  { %118 = vst.msk [vmem:[#allocation7] sm:$0xf] %vm117_vm2, %v144_v5 }
  0xe9   :  { %v105_v7 = vpop.f32.mrf.mxu0 }
  0xea   :  { %v145_v8 = vpack.c.bf16 %v105_v7, %v105_v7 }
  0xeb   :  { %v156_v9 = vpop.f32.mrf.mxu0 }
  0xec   :  { %119 = vst.msk [vmem:[#allocation7 + $0x4] sm:$0xf] %vm117_vm2, %v145_v8 }
  0xed   :  { %218 = shalt.err (!%p215_p0)
}
  0xee   :  { %131 = dma.vmem_to_hbm [thread:$0]  %s126_s1, 128, %s275_s2, [#allocation4], %s234_s12, %s234_s12, %s235_s13  }
  0xef   :  { %231 = dma.done.wait [#allocation4], 128  }
  0xf0   :  { %232 = vsyncadd [#allocation4], 4294967168 }
  0xf1   :  { %135 = vsyncpa [#allocation3], 1 }
  0xf2   :  { %136 = vsyncpa [#allocation6], 1 }
  0xf3   :  { %137 = vsyncpa [#allocation4], 1 }

</bundles_post_ra>
